<compile_context>
chip_gen: v7x
topology: tpu7x:2x2x1
jax: 0.10.0
libtpu: 0.0.40
codegen_flags: <defaults>
</compile_context>

<pallas_src>
import functools

import jax
import jax.numpy as jnp
from jax.experimental import pallas as pl
from jax.experimental.pallas import tpu as pltpu


# -----------------------------------------------------------------------------
# Pallas kernel: full CrystalGNN forward (eval mode), BN pre-folded.
# One grid step == one graph-batch (N = G * P nodes, G graphs of P nodes each).
# -----------------------------------------------------------------------------
def crystal_gnn_kernel(
    x_ref,      # [N, F]      node features                (streamed per step)
    ahat_ref,   # [N, N]      D^-1/2 (A+I) D^-1/2          (streamed per step)
    w1_ref,     # [F, H]      layer-1 GCN weight (BN folded)   (resident)
    gw_ref,     # [2, H, H]   layer-2/3 GCN weights (BN folded)(resident)
    cw_ref,     # [4, W, W]   wc1a, wc1b, wc2(pad), wc3(pad)   (resident)
    bias_ref,   # [6, W]      b1', b2', b3', bc1, bc2(pad), bc3(pad) (resident)
    out_ref,    # [G, C]      log_softmax output
    *,
    hidden_dim,
    num_classes,
    graphs_per_batch,
    nodes_per_graph,
):
    H = hidden_dim
    C = num_classes
    G = graphs_per_batch
    P = nodes_per_graph

    x = x_ref[...]
    ahat = ahat_ref[...]
    gw = gw_ref[...]
    cw = cw_ref[...]
    bias = bias_ref[...]

    # ---- GCN layer 1:  (Ahat @ X) @ W1' + b1'  (reassociated, F <= H) -------
    h = jnp.dot(ahat, x, preferred_element_type=jnp.float32)            # [N, F]
    h = jnp.dot(h, w1_ref[...], preferred_element_type=jnp.float32)     # [N, H]
    h = jnp.maximum(h + bias[0, :H][None, :], 0.0)

    # ---- GCN layers 2..3:  Ahat @ (H @ Wl') + bl'  --------------------------
    for l in range(2):
        t = jnp.dot(h, gw[l], preferred_element_type=jnp.float32)       # [N, H]
        t = jnp.dot(ahat, t, preferred_element_type=jnp.float32)        # [N, H]
        h = jnp.maximum(t + bias[l + 1, :H][None, :], 0.0)

    # ---- Global pooling: segmented reduction over contiguous fixed-size graphs
    # TODO(synk): variable nodes-per-graph would need per-graph (offset, count)
    # scalars via PrefetchScalarGridSpec and pl.ds-sliced reductions.
    hg = h.reshape(G, P, H)                                              # [G, P, H]
    x_mean = jnp.mean(hg, axis=1)                                        # [G, H]
    x_max = jnp.max(hg, axis=1)                                          # [G, H]

    # ---- Classifier (wc1 pre-split -> no lane concat) ------------------------
    z = (jnp.dot(x_mean, cw[0, :H, :], preferred_element_type=jnp.float32)
         + jnp.dot(x_max, cw[1, :H, :], preferred_element_type=jnp.float32)
         + bias[3][None, :])
    z = jnp.maximum(z, 0.0)
    z = jnp.dot(z, cw[2], preferred_element_type=jnp.float32) + bias[4][None, :]
    z = jnp.maximum(z, 0.0)
    logits = jnp.dot(z, cw[3], preferred_element_type=jnp.float32) + bias[5][None, :]
    logits = logits[:, :C]                                               # drop any pad

    # ---- log_softmax over classes -------------------------------------------
    m = jnp.max(logits, axis=1, keepdims=True)
    s = logits - m
    out_ref[...] = s - jnp.log(jnp.sum(jnp.exp(s), axis=1, keepdims=True))


def crystal_gnn_forward(x, ahat, packed, *, hidden_dim, num_classes,
                        graphs_per_batch, nodes_per_graph):
    """x: [B, N, F]; ahat: [B, N, N]; packed = (w1, gcn_w, cls_w, biases)."""
    w1, gcn_w, cls_w, biases = packed
    B, N, F_dim = x.shape
    G = graphs_per_batch
    H = hidden_dim
    C = num_classes
    W = cls_w.shape[-1]

    kernel = functools.partial(
        crystal_gnn_kernel,
        hidden_dim=hidden_dim,
        num_classes=num_classes,
        graphs_per_batch=graphs_per_batch,
        nodes_per_graph=nodes_per_graph,
    )

    grid_spec = pltpu.PrefetchScalarGridSpec(
        num_scalar_prefetch=0,
        grid=(B,),
        in_specs=[
            # streamed per grid step (double-buffered by the pipeline)
            pl.BlockSpec((None, N, F_dim), lambda b: (b, 0, 0)),   # x
            pl.BlockSpec((None, N, N), lambda b: (b, 0, 0)),       # ahat
            # constant block index -> DMA'd once, VMEM-resident across steps
            pl.BlockSpec((F_dim, H), lambda b: (0, 0)),            # w1
            pl.BlockSpec((2, H, H), lambda b: (0, 0, 0)),          # gcn_w
            pl.BlockSpec((4, W, W), lambda b: (0, 0, 0)),          # cls_w
            pl.BlockSpec((6, W), lambda b: (0, 0)),                # biases
        ],
        out_specs=pl.BlockSpec((None, G, C), lambda b: (b, 0, 0)),
    )

    return pl.pallas_call(
        kernel,
        out_shape=jax.ShapeDtypeStruct((B, G, C), jnp.float32),
        grid_spec=grid_spec,
        compiler_params=pltpu.CompilerParams(
            dimension_semantics=("parallel",),   # batch axis shards across TCs (v7x)
        ),
    )(x, ahat, w1, gcn_w, cls_w, biases)


# -----------------------------------------------------------------------------
# Param packing: fold eval-mode BN into GCN weights, split wc1, pad + stack
# -----------------------------------------------------------------------------
def pack_params(params, hidden_dim, num_classes, eps=1e-5):
    H = hidden_dim
    C = num_classes
    W = max(H, C)  # common lane width for classifier / bias slabs
    assert H <= W and C <= W

    def fold(w, b, bn):
        gamma, beta, mean, var = bn[0], bn[1], bn[2], bn[3]
        s = gamma / jnp.sqrt(var + eps)
        return w * s[None, :], (b - mean) * s + beta

    w1, b1 = fold(params["w1"], params["b1"], params["bn1"])
    w2, b2 = fold(params["w2"], params["b2"], params["bn2"])
    w3, b3 = fold(params["w3"], params["b3"], params["bn3"])
    gcn_w = jnp.stack([w2, w3])                                   # [2, H, H]

    # INVARIANT: padded rows/cols are exactly zero; together with ReLU(0)=0 and
    # zero-padded biases this keeps padded lanes inert through the classifier.
    def pad2(w):
        return jnp.pad(w, ((0, W - w.shape[0]), (0, W - w.shape[1])))

    def pad1(v):
        return jnp.pad(v, (0, W - v.shape[0]))

    cls_w = jnp.stack([
        pad2(params["wc1"][:H]),      # wc1a (acts on mean-pooled features)
        pad2(params["wc1"][H:]),      # wc1b (acts on max-pooled features)
        pad2(params["wc2"]),
        pad2(params["wc3"]),
    ])                                                            # [4, W, W]

    biases = jnp.stack([
        pad1(b1), pad1(b2), pad1(b3),
        pad1(params["bc1"]), pad1(params["bc2"]), pad1(params["bc3"]),
    ])                                                            # [6, W]

    return w1, gcn_w, cls_w, biases


# -----------------------------------------------------------------------------
# Glue: batched graph construction, normalized adjacency, deterministic params
# -----------------------------------------------------------------------------
def build_batched_adjacency(key, num_batches, graphs_per_batch, nodes_per_graph):
    """[B, N, N] sym-normalized adjacencies; graphs are contiguous node blocks."""
    N = graphs_per_batch * nodes_per_graph
    mats = []
    for b in range(num_batches):
        a = jnp.zeros((N, N), jnp.float32)
        for g in range(graphs_per_batch):
            kg = jax.random.fold_in(jax.random.fold_in(key, b), g)
            u = jax.random.uniform(kg, (nodes_per_graph, nodes_per_graph))
            adj = ((u + u.T) > 1.2).astype(jnp.float32)   # random undirected edges
            base = g * nodes_per_graph
            a = a.at[base:base + nodes_per_graph, base:base + nodes_per_graph].set(adj)
        idx = jnp.arange(N)
        a = a.at[idx, idx].set(1.0)                       # self loops
        deg = jnp.sum(a, axis=1)
        dinv = 1.0 / jnp.sqrt(jnp.maximum(deg, 1.0))
        mats.append(dinv[:, None] * a * dinv[None, :])
    return jnp.stack(mats)


def init_params(key, input_dim, hidden_dim, num_classes):
    ks = jax.random.split(key, 16)

    def lin(k, fan_in, fan_out):
        return 0.1 * jax.random.normal(k, (fan_in, fan_out), jnp.float32)

    def bn(k, h):
        k1, k2, k3, k4 = jax.random.split(k, 4)
        gamma = 1.0 + 0.1 * jax.random.normal(k1, (h,), jnp.float32)
        beta = 0.1 * jax.random.normal(k2, (h,), jnp.float32)
        mean = 0.1 * jax.random.normal(k3, (h,), jnp.float32)
        var = 1.0 + 0.1 * jax.random.uniform(k4, (h,), jnp.float32)
        return jnp.stack([gamma, beta, mean, var])    # rows: gamma, beta, mean, var

    return {
        "w1": lin(ks[0], input_dim, hidden_dim),
        "b1": 0.1 * jax.random.normal(ks[1], (hidden_dim,), jnp.float32),
        "bn1": bn(ks[2], hidden_dim),
        "w2": lin(ks[3], hidden_dim, hidden_dim),
        "b2": 0.1 * jax.random.normal(ks[4], (hidden_dim,), jnp.float32),
        "bn2": bn(ks[5], hidden_dim),
        "w3": lin(ks[6], hidden_dim, hidden_dim),
        "b3": 0.1 * jax.random.normal(ks[7], (hidden_dim,), jnp.float32),
        "bn3": bn(ks[8], hidden_dim),
        "wc1": lin(ks[9], 2 * hidden_dim, hidden_dim),
        "bc1": 0.1 * jax.random.normal(ks[10], (hidden_dim,), jnp.float32),
        "wc2": lin(ks[11], hidden_dim, hidden_dim // 2),
        "bc2": 0.1 * jax.random.normal(ks[12], (hidden_dim // 2,), jnp.float32),
        "wc3": lin(ks[13], hidden_dim // 2, num_classes),
        "bc3": 0.1 * jax.random.normal(ks[14], (num_classes,), jnp.float32),
    }


# Pure-JAX reference of the original (unfolded) forward for one graph-batch.
def reference_forward(x, ahat, params, graphs_per_batch, nodes_per_graph, eps=1e-5):
    hp = jax.lax.Precision.HIGHEST
    h = x
    for i in (1, 2, 3):
        w, b, bn = params[f"w{i}"], params[f"b{i}"], params[f"bn{i}"]
        h = jnp.dot(ahat, jnp.dot(h, w, precision=hp), precision=hp) + b[None, :]
        gamma, beta, mean, var = bn[0], bn[1], bn[2], bn[3]
        h = (h - mean[None, :]) * (gamma / jnp.sqrt(var + eps))[None, :] + beta[None, :]
        h = jnp.maximum(h, 0.0)
    hg = h.reshape(graphs_per_batch, nodes_per_graph, -1)
    x_mean = jnp.mean(hg, axis=1)
    x_max = jnp.max(hg, axis=1)
    feat = jnp.concatenate([x_mean, x_max], axis=1)
    z = jnp.maximum(jnp.dot(feat, params["wc1"], precision=hp) + params["bc1"], 0.0)
    z = jnp.maximum(jnp.dot(z, params["wc2"], precision=hp) + params["bc2"], 0.0)
    logits = jnp.dot(z, params["wc3"], precision=hp) + params["bc3"]
    return jax.nn.log_softmax(logits, axis=1)


if __name__ == "__main__":
    # Small shapes consistent with the module:
    #   B=4 independent graph-batches, each with 2 graphs x 16 nodes
    #   (32 nodes per batch), input_dim=16, hidden_dim=32, num_layers=3,
    #   num_classes=32.
    num_batches = 4
    graphs_per_batch = 2
    nodes_per_graph = 16
    num_nodes = graphs_per_batch * nodes_per_graph
    input_dim = 16
    hidden_dim = 32
    num_classes = 32

    key = jax.random.PRNGKey(0)
    k_x, k_a, k_p = jax.random.split(key, 3)

    x = jax.random.normal(k_x, (num_batches, num_nodes, input_dim), jnp.float32)
    ahat = build_batched_adjacency(k_a, num_batches, graphs_per_batch, nodes_per_graph)
    params = init_params(k_p, input_dim, hidden_dim, num_classes)
    packed = pack_params(params, hidden_dim, num_classes)

    out = crystal_gnn_forward(
        x, ahat, packed,
        hidden_dim=hidden_dim, num_classes=num_classes,
        graphs_per_batch=graphs_per_batch, nodes_per_graph=nodes_per_graph,
    )
    out = jax.block_until_ready(out)

    assert out.shape == (num_batches, graphs_per_batch, num_classes)
    # log_softmax rows should sum to ~1 in prob space
    assert jnp.allclose(jnp.sum(jnp.exp(out), axis=-1), 1.0, atol=1e-4)
    # match the unfolded pure-JAX reference of the original forward
    ref = jax.vmap(
        lambda xb, ab: reference_forward(xb, ab, params, graphs_per_batch, nodes_per_graph)
    )(x, ahat)
    assert jnp.allclose(out, ref, atol=2e-3, rtol=2e-3)
    print("KERNEL_OK")
</pallas_src>

<mosaic_0001>
module attributes {stable_mosaic.version = 11 : i64} {
  func.func @crystal_gnn_kernel(%arg0: i32, %arg1: memref<1x32x16xf32, #tpu.memory_space<vmem>>, %arg2: memref<1x32x32xf32, #tpu.memory_space<vmem>>, %arg3: memref<16x32xf32, #tpu.memory_space<vmem>>, %arg4: memref<2x32x32xf32, #tpu.memory_space<vmem>>, %arg5: memref<4x32x32xf32, #tpu.memory_space<vmem>>, %arg6: memref<6x32xf32, #tpu.memory_space<vmem>>, %arg7: memref<1x2x32xf32, #tpu.memory_space<vmem>>) attributes {dimension_semantics = [#tpu.dimension_semantics<parallel>], iteration_bounds = array<i64: 4>, scalar_prefetch = 0 : i64, scratch_operands = 0 : i64, tpu.core_type = #tpu.core_type<tc>, window_params = [{transform_indices = @transform_0, window_bounds = array<i64: 1, 32, 16>}, {transform_indices = @transform_1, window_bounds = array<i64: 1, 32, 32>}, {pipeline_mode = #tpu.pipeline_mode<synchronous>, transform_indices = @transform_2, window_bounds = array<i64: 16, 32>}, {pipeline_mode = #tpu.pipeline_mode<synchronous>, transform_indices = @transform_3, window_bounds = array<i64: 2, 32, 32>}, {pipeline_mode = #tpu.pipeline_mode<synchronous>, transform_indices = @transform_4, window_bounds = array<i64: 4, 32, 32>}, {pipeline_mode = #tpu.pipeline_mode<synchronous>, transform_indices = @transform_5, window_bounds = array<i64: 6, 32>}, {transform_indices = @transform_6, window_bounds = array<i64: 1, 2, 32>}]} {
    %c0 = arith.constant 0 : index
    %c0_0 = arith.constant 0 : index
    %c0_1 = arith.constant 0 : index
    %0 = vector.load %arg1[%c0, %c0_0, %c0_1] : memref<1x32x16xf32, #tpu.memory_space<vmem>>, vector<1x32x16xf32>
    %1 = vector.shape_cast %0 : vector<1x32x16xf32> to vector<32x16xf32>
    %c0_2 = arith.constant 0 : index
    %c0_3 = arith.constant 0 : index
    %c0_4 = arith.constant 0 : index
    %2 = vector.load %arg2[%c0_2, %c0_3, %c0_4] : memref<1x32x32xf32, #tpu.memory_space<vmem>>, vector<1x32x32xf32>
    %3 = vector.shape_cast %2 : vector<1x32x32xf32> to vector<32x32xf32>
    %c0_5 = arith.constant 0 : index
    %c0_6 = arith.constant 0 : index
    %c0_7 = arith.constant 0 : index
    %4 = vector.load %arg4[%c0_5, %c0_6, %c0_7] : memref<2x32x32xf32, #tpu.memory_space<vmem>>, vector<2x32x32xf32>
    %c0_8 = arith.constant 0 : index
    %c0_9 = arith.constant 0 : index
    %c0_10 = arith.constant 0 : index
    %5 = vector.load %arg5[%c0_8, %c0_9, %c0_10] : memref<4x32x32xf32, #tpu.memory_space<vmem>>, vector<4x32x32xf32>
    %c0_11 = arith.constant 0 : index
    %c0_12 = arith.constant 0 : index
    %6 = vector.load %arg6[%c0_11, %c0_12] : memref<6x32xf32, #tpu.memory_space<vmem>>, vector<6x32xf32>
    %cst = arith.constant dense<0.000000e+00> : vector<32x16xf32>
    %7 = tpu.matmul %3, %1, %cst {dimension_numbers = #tpu.dot_dimension_numbers<[1], [0], [0], [1], [0, 0, 1, 1], [], []>} : vector<32x32xf32>, vector<32x16xf32>, vector<32x16xf32> -> vector<32x16xf32>
    %c0_13 = arith.constant 0 : index
    %c0_14 = arith.constant 0 : index
    %8 = vector.load %arg3[%c0_13, %c0_14] : memref<16x32xf32, #tpu.memory_space<vmem>>, vector<16x32xf32>
    %cst_15 = arith.constant dense<0.000000e+00> : vector<32x32xf32>
    %9 = tpu.matmul %7, %8, %cst_15 {dimension_numbers = #tpu.dot_dimension_numbers<[1], [0], [0], [1], [0, 0, 1, 1], [], []>} : vector<32x16xf32>, vector<16x32xf32>, vector<32x32xf32> -> vector<32x32xf32>
    %10 = vector.extract_strided_slice %6 {offsets = [0, 0], sizes = [1, 32], strides = [1, 1]} : vector<6x32xf32> to vector<1x32xf32>
    %11 = vector.shape_cast %10 : vector<1x32xf32> to vector<32xf32>
    %12 = vector.shape_cast %11 : vector<32xf32> to vector<1x32xf32>
    %13 = vector.broadcast %12 : vector<1x32xf32> to vector<32x32xf32>
    %14 = arith.addf %9, %13 : vector<32x32xf32>
    %cst_16 = arith.constant 0.000000e+00 : f32
    %15 = vector.broadcast %cst_16 : f32 to vector<32x32xf32>
    %16 = arith.maximumf %14, %15 : vector<32x32xf32>
    %17 = vector.extract_strided_slice %4 {offsets = [0, 0, 0], sizes = [1, 32, 32], strides = [1, 1, 1]} : vector<2x32x32xf32> to vector<1x32x32xf32>
    %18 = vector.shape_cast %17 : vector<1x32x32xf32> to vector<32x32xf32>
    %cst_17 = arith.constant dense<0.000000e+00> : vector<32x32xf32>
    %19 = tpu.matmul %16, %18, %cst_17 {dimension_numbers = #tpu.dot_dimension_numbers<[1], [0], [0], [1], [0, 0, 1, 1], [], []>} : vector<32x32xf32>, vector<32x32xf32>, vector<32x32xf32> -> vector<32x32xf32>
    %cst_18 = arith.constant dense<0.000000e+00> : vector<32x32xf32>
    %20 = tpu.matmul %3, %19, %cst_18 {dimension_numbers = #tpu.dot_dimension_numbers<[1], [0], [0], [1], [0, 0, 1, 1], [], []>} : vector<32x32xf32>, vector<32x32xf32>, vector<32x32xf32> -> vector<32x32xf32>
    %21 = vector.extract_strided_slice %6 {offsets = [1, 0], sizes = [1, 32], strides = [1, 1]} : vector<6x32xf32> to vector<1x32xf32>
    %22 = vector.shape_cast %21 : vector<1x32xf32> to vector<32xf32>
    %23 = vector.shape_cast %22 : vector<32xf32> to vector<1x32xf32>
    %24 = vector.broadcast %23 : vector<1x32xf32> to vector<32x32xf32>
    %25 = arith.addf %20, %24 : vector<32x32xf32>
    %cst_19 = arith.constant 0.000000e+00 : f32
    %26 = vector.broadcast %cst_19 : f32 to vector<32x32xf32>
    %27 = arith.maximumf %25, %26 : vector<32x32xf32>
    %28 = vector.extract_strided_slice %4 {offsets = [1, 0, 0], sizes = [1, 32, 32], strides = [1, 1, 1]} : vector<2x32x32xf32> to vector<1x32x32xf32>
    %29 = vector.shape_cast %28 : vector<1x32x32xf32> to vector<32x32xf32>
    %cst_20 = arith.constant dense<0.000000e+00> : vector<32x32xf32>
    %30 = tpu.matmul %27, %29, %cst_20 {dimension_numbers = #tpu.dot_dimension_numbers<[1], [0], [0], [1], [0, 0, 1, 1], [], []>} : vector<32x32xf32>, vector<32x32xf32>, vector<32x32xf32> -> vector<32x32xf32>
    %cst_21 = arith.constant dense<0.000000e+00> : vector<32x32xf32>
    %31 = tpu.matmul %3, %30, %cst_21 {dimension_numbers = #tpu.dot_dimension_numbers<[1], [0], [0], [1], [0, 0, 1, 1], [], []>} : vector<32x32xf32>, vector<32x32xf32>, vector<32x32xf32> -> vector<32x32xf32>
    %32 = vector.extract_strided_slice %6 {offsets = [2, 0], sizes = [1, 32], strides = [1, 1]} : vector<6x32xf32> to vector<1x32xf32>
    %33 = vector.shape_cast %32 : vector<1x32xf32> to vector<32xf32>
    %34 = vector.shape_cast %33 : vector<32xf32> to vector<1x32xf32>
    %35 = vector.broadcast %34 : vector<1x32xf32> to vector<32x32xf32>
    %36 = arith.addf %31, %35 : vector<32x32xf32>
    %cst_22 = arith.constant 0.000000e+00 : f32
    %37 = vector.broadcast %cst_22 : f32 to vector<32x32xf32>
    %38 = arith.maximumf %36, %37 : vector<32x32xf32>
    %39 = vector.shape_cast %38 : vector<32x32xf32> to vector<2x16x32xf32>
    %cst_23 = arith.constant dense<0.000000e+00> : vector<2x32xf32>
    %40 = vector.multi_reduction <add>, %39, %cst_23 [1] : vector<2x16x32xf32> to vector<2x32xf32>
    %cst_24 = arith.constant 1.600000e+01 : f32
    %41 = vector.broadcast %cst_24 : f32 to vector<2x32xf32>
    %42 = arith.divf %40, %41 : vector<2x32xf32>
    %cst_25 = arith.constant dense<0xFF800000> : vector<2x32xf32>
    %43 = vector.multi_reduction <maximumf>, %39, %cst_25 [1] : vector<2x16x32xf32> to vector<2x32xf32>
    %44 = vector.extract_strided_slice %5 {offsets = [0, 0, 0], sizes = [1, 32, 32], strides = [1, 1, 1]} : vector<4x32x32xf32> to vector<1x32x32xf32>
    %45 = vector.shape_cast %44 : vector<1x32x32xf32> to vector<32x32xf32>
    %cst_26 = arith.constant dense<0.000000e+00> : vector<2x32xf32>
    %46 = tpu.matmul %42, %45, %cst_26 {dimension_numbers = #tpu.dot_dimension_numbers<[1], [0], [0], [1], [0, 0, 1, 1], [], []>} : vector<2x32xf32>, vector<32x32xf32>, vector<2x32xf32> -> vector<2x32xf32>
    %47 = vector.extract_strided_slice %5 {offsets = [1, 0, 0], sizes = [1, 32, 32], strides = [1, 1, 1]} : vector<4x32x32xf32> to vector<1x32x32xf32>
    %48 = vector.shape_cast %47 : vector<1x32x32xf32> to vector<32x32xf32>
    %cst_27 = arith.constant dense<0.000000e+00> : vector<2x32xf32>
    %49 = tpu.matmul %43, %48, %cst_27 {dimension_numbers = #tpu.dot_dimension_numbers<[1], [0], [0], [1], [0, 0, 1, 1], [], []>} : vector<2x32xf32>, vector<32x32xf32>, vector<2x32xf32> -> vector<2x32xf32>
    %50 = arith.addf %46, %49 : vector<2x32xf32>
    %51 = vector.extract_strided_slice %6 {offsets = [3, 0], sizes = [1, 32], strides = [1, 1]} : vector<6x32xf32> to vector<1x32xf32>
    %52 = vector.shape_cast %51 : vector<1x32xf32> to vector<32xf32>
    %53 = vector.shape_cast %52 : vector<32xf32> to vector<1x32xf32>
    %54 = vector.broadcast %53 : vector<1x32xf32> to vector<2x32xf32>
    %55 = arith.addf %50, %54 : vector<2x32xf32>
    %cst_28 = arith.constant 0.000000e+00 : f32
    %56 = vector.broadcast %cst_28 : f32 to vector<2x32xf32>
    %57 = arith.maximumf %55, %56 : vector<2x32xf32>
    %58 = vector.extract_strided_slice %5 {offsets = [2, 0, 0], sizes = [1, 32, 32], strides = [1, 1, 1]} : vector<4x32x32xf32> to vector<1x32x32xf32>
    %59 = vector.shape_cast %58 : vector<1x32x32xf32> to vector<32x32xf32>
    %cst_29 = arith.constant dense<0.000000e+00> : vector<2x32xf32>
    %60 = tpu.matmul %57, %59, %cst_29 {dimension_numbers = #tpu.dot_dimension_numbers<[1], [0], [0], [1], [0, 0, 1, 1], [], []>} : vector<2x32xf32>, vector<32x32xf32>, vector<2x32xf32> -> vector<2x32xf32>
    %61 = vector.extract_strided_slice %6 {offsets = [4, 0], sizes = [1, 32], strides = [1, 1]} : vector<6x32xf32> to vector<1x32xf32>
    %62 = vector.shape_cast %61 : vector<1x32xf32> to vector<32xf32>
    %63 = vector.shape_cast %62 : vector<32xf32> to vector<1x32xf32>
    %64 = vector.broadcast %63 : vector<1x32xf32> to vector<2x32xf32>
    %65 = arith.addf %60, %64 : vector<2x32xf32>
    %cst_30 = arith.constant 0.000000e+00 : f32
    %66 = vector.broadcast %cst_30 : f32 to vector<2x32xf32>
    %67 = arith.maximumf %65, %66 : vector<2x32xf32>
    %68 = vector.extract_strided_slice %5 {offsets = [3, 0, 0], sizes = [1, 32, 32], strides = [1, 1, 1]} : vector<4x32x32xf32> to vector<1x32x32xf32>
    %69 = vector.shape_cast %68 : vector<1x32x32xf32> to vector<32x32xf32>
    %cst_31 = arith.constant dense<0.000000e+00> : vector<2x32xf32>
    %70 = tpu.matmul %67, %69, %cst_31 {dimension_numbers = #tpu.dot_dimension_numbers<[1], [0], [0], [1], [0, 0, 1, 1], [], []>} : vector<2x32xf32>, vector<32x32xf32>, vector<2x32xf32> -> vector<2x32xf32>
    %71 = vector.extract_strided_slice %6 {offsets = [5, 0], sizes = [1, 32], strides = [1, 1]} : vector<6x32xf32> to vector<1x32xf32>
    %72 = vector.shape_cast %71 : vector<1x32xf32> to vector<32xf32>
    %73 = vector.shape_cast %72 : vector<32xf32> to vector<1x32xf32>
    %74 = vector.broadcast %73 : vector<1x32xf32> to vector<2x32xf32>
    %75 = arith.addf %70, %74 : vector<2x32xf32>
    %cst_32 = arith.constant dense<0xFF800000> : vector<2xf32>
    %76 = vector.multi_reduction <maximumf>, %75, %cst_32 [1] : vector<2x32xf32> to vector<2xf32>
    %77 = vector.shape_cast %76 : vector<2xf32> to vector<2x1xf32>
    %78 = vector.broadcast %77 : vector<2x1xf32> to vector<2x32xf32>
    %79 = arith.subf %75, %78 : vector<2x32xf32>
    %80 = math.exp %79 : vector<2x32xf32>
    %cst_33 = arith.constant dense<0.000000e+00> : vector<2xf32>
    %81 = vector.multi_reduction <add>, %80, %cst_33 [1] : vector<2x32xf32> to vector<2xf32>
    %82 = vector.shape_cast %81 : vector<2xf32> to vector<2x1xf32>
    %83 = math.log %82 : vector<2x1xf32>
    %84 = vector.broadcast %83 : vector<2x1xf32> to vector<2x32xf32>
    %85 = arith.subf %79, %84 : vector<2x32xf32>
    %c0_34 = arith.constant 0 : index
    %c0_35 = arith.constant 0 : index
    %c0_36 = arith.constant 0 : index
    %86 = vector.load %arg7[%c0_34, %c0_35, %c0_36] : memref<1x2x32xf32, #tpu.memory_space<vmem>>, vector<1x2x32xf32>
    %87 = vector.shape_cast %86 : vector<1x2x32xf32> to vector<2x32xf32>
    %88 = vector.shape_cast %85 : vector<2x32xf32> to vector<1x2x32xf32>
    tpu.vector_store %arg7[%c0_34, %c0_35, %c0_36], %88 {strides = array<i32>} : memref<1x2x32xf32, #tpu.memory_space<vmem>>, vector<1x2x32xf32>,
    return
  }
  func.func @transform_0(%arg0: i32) -> (i32, i32, i32) {
    %c0_i32 = arith.constant 0 : i32
    %c0_i32_0 = arith.constant 0 : i32
    %c0_i32_1 = arith.constant 0 : i32
    return %arg0, %c0_i32, %c0_i32_0 : i32, i32, i32
  }
  func.func @transform_1(%arg0: i32) -> (i32, i32, i32) {
    %c0_i32 = arith.constant 0 : i32
    %c0_i32_0 = arith.constant 0 : i32
    %c0_i32_1 = arith.constant 0 : i32
    return %arg0, %c0_i32, %c0_i32_0 : i32, i32, i32
  }
  func.func @transform_2(%arg0: i32) -> (i32, i32) {
    %c0_i32 = arith.constant 0 : i32
    %c0_i32_0 = arith.constant 0 : i32
    %c0_i32_1 = arith.constant 0 : i32
    return %c0_i32, %c0_i32_0 : i32, i32
  }
  func.func @transform_3(%arg0: i32) -> (i32, i32, i32) {
    %c0_i32 = arith.constant 0 : i32
    %c0_i32_0 = arith.constant 0 : i32
    %c0_i32_1 = arith.constant 0 : i32
    %c0_i32_2 = arith.constant 0 : i32
    return %c0_i32, %c0_i32_0, %c0_i32_1 : i32, i32, i32
  }
  func.func @transform_4(%arg0: i32) -> (i32, i32, i32) {
    %c0_i32 = arith.constant 0 : i32
    %c0_i32_0 = arith.constant 0 : i32
    %c0_i32_1 = arith.constant 0 : i32
    %c0_i32_2 = arith.constant 0 : i32
    return %c0_i32, %c0_i32_0, %c0_i32_1 : i32, i32, i32
  }
  func.func @transform_5(%arg0: i32) -> (i32, i32) {
    %c0_i32 = arith.constant 0 : i32
    %c0_i32_0 = arith.constant 0 : i32
    %c0_i32_1 = arith.constant 0 : i32
    return %c0_i32, %c0_i32_0 : i32, i32
  }
  func.func @transform_6(%arg0: i32) -> (i32, i32, i32) {
    %c0_i32 = arith.constant 0 : i32
    %c0_i32_0 = arith.constant 0 : i32
    %c0_i32_1 = arith.constant 0 : i32
    return %arg0, %c0_i32, %c0_i32_0 : i32, i32, i32
  }
}

</mosaic_0001>

<bundles_post_ra>
// kernel: tpu_custom_call.1
= control target key start
LH: loop header
LB: loop body
LE: loop exit
PB: predicated region body
PF: predicated region fallthrough
CT: control target
= control target key end

     0   :  { %11 = vsyncpa [#allocation3], 0  ;;  %s2225_s0 = inlined_call_operand.vmem [shape: f32[4,32,16], index: 0, kind: input, shape index: {}]   ;;  %s2226_s1 = inlined_call_operand.vmem [shape: f32[4,32,32], index: 1, kind: input, shape index: {}]   ;;  %s2227_s2 = inlined_call_operand.hbm [shape: f32[16,32], index: 2, kind: input, shape index: {}]   ;;  %s2228_s3 = inlined_call_operand.vmem [shape: f32[2,32,32], index: 3, kind: input, shape index: {}]   ;;  %s2229_s4 = inlined_call_operand.hbm [shape: f32[4,32,32], index: 4, kind: input, shape index: {}]   ;;  %s2230_s5 = inlined_call_operand.vmem [shape: f32[6,32], index: 5, kind: input, shape index: {}]   ;;  %s2231_s6 = inlined_call_operand.hbm [shape: f32[4,2,32], index: 6, kind: output, shape index: {}]  }
   0x1   :  { %12 = vsyncpa [#allocation6], 0 }
   0x2   :  { %13 = vsyncpa [#allocation4], 0 }
   0x3   :  { %15 = vsyncpa [#allocation4 + $0x1], 0  ;;  %s1936_s21 = smov 0   ;;  %s1938_s22 = smov 0  }
   0x4   :  { %s1940_s23 = smov 0   ;;  %s1942_s24 = smov 0  }
   0x5 LB: > { %s1957_s25 = sadd.s32 4294967295, %s1891_s24   ;;  %s1391_s26 = sadd.s32 4294967294, %s1891_s24   ;;  %s1891_s24 = sphi %s1942_s24, %s2249_s24   ;;  %s1887_s23 = sphi %s1940_s23, %s2248_s23   ;;  %s1883_s22 = sphi %s1938_s22, %s2247_s22   ;;  %s1879_s21 = sphi %s1936_s21, %s2246_s21  }
   0x6   : > { %s1961_s27 = sadd.s32 1, %s1891_s24   ;;  %s164_s28 = sadd.s32 1, %s1887_s23 }
   0x7   : > { %s161_s29 = ssub.s32 %s1891_s24, %s1961_s27  ;;  %p174_p0 = scmp.ne.s32.totalorder %s1887_s23, %s1883_s22 }
   0x8   : > { %p162_p1 = scmp.eq.s32.totalorder %s161_s29, 0  ;;  %p175_p2 = scmp.eq.s32.totalorder %s1957_s25, 3 }
   0x9   : > { %p180_p3 = scmp.ne.s32.totalorder %s1883_s22, %s1879_s21  ;;  %p181_p4 = scmp.eq.s32.totalorder %s1391_s26, 3 }
   0xa   : > { %s1972_s30 = scalar_select %p162_p1, %s1887_s23, %s164_s28  }
   0xb   : > { %p1974_p5 = por %p175_p2, %p174_p0  ;;  %p1978_p6 = por %p181_p4, %p180_p3 }
   0xc   : > { %p1392_p7 = scmp.ge.s32.totalorder %s1891_s24, 1  ;;  %p188_p8 = scmp.lt.s32.totalorder %s1891_s24, 5 }
   0xd   : > { %s2235_s7 = scalar_select %p1974_p5, 1, 0 }
   0xe   : > { %s2236_s8 = scalar_select %p1978_p6, 1, 0 }
   0xf   : > { %p2232_p9 = scmp.eq.s32.totalorder %s1957_s25, 0  ;;  %p1985_p10 = pnand %p1392_p7, %p188_p8 }
  0x10   : > { %s1893_s10 = smov [#allocation2]   ;;  %s1894_s13 = smov [#allocation5]  }
  0x11   : > { %s2237_s9 = scalar_select %p1985_p10, 1, 0 }
  0x12   : > { %s200_s11 = sshll.u32 %s1893_s10, 4  ;;  %p1706_p11 = pneg %p1985_p10  ;;  %s201_s11 = int_to_ptr.vmem [resolvable:$true] %s200_s11 }
  0x13   : > { %s216_s14 = sshll.u32 %s1894_s13, 4  ;;  %s1765_s17 = scalar_lea.hbm %s2227_s2, 256  ;;  %s1997_s14 = int_to_ptr.vmem [resolvable:$true] %s216_s14 }
  0x14   : > { %p1993_p12 = pnand %p2232_p9, %p1706_p11  ;;  %p1766_p13 = scmp.ne.s32.totalorder %s2227_s2, %s1765_s17 }
  0x15   : > { %p1772_p3 = scmp.lt.u32.totalorder %s1765_s17, %s2227_s2 }
  0x16   : > { %p1767_p0 = pneg %p1993_p12 }
  0x18   : > { %p1768_p1 = pnand %p1767_p0, %p1766_p13 }
  0x1a   : > { %p1769_p2 = pneg %p1768_p1 }
  0x1c   : > { %p1774_p4 = pnand %p1772_p3, %p1769_p2 }
  0x1e   : > { %1777 = shalt.err (!%p1774_p4)
}
  0x1f   : > { %s1778_s28 = scalar_lea.vmem %s201_s11, 256  ;;  %p1786_p9 = scmp.lt.s32.totalorder %s201_s11, %s201_s11 }
  0x20   : > { %p1779_p7 = scmp.ne.s32.totalorder %s201_s11, %s1778_s28  ;;  %p1787_p6 = scmp.lt.s32.totalorder %s1778_s28, %s1778_s28 }
  0x22   : > { %p1781_p8 = pnand %p1779_p7, %p1767_p0  ;;  %p1788_p5 = por %p1787_p6, %p1786_p9 }
  0x24   : > { %p1782_p11 = pneg %p1781_p8 }
  0x26   : > { %p1789_p10 = pnand %p1788_p5, %p1782_p11 }
  0x28   : > { %1792 = shalt.err (!%p1789_p10)
}
  0x29   : > { %s1895_s29 = smov 128   ;;  %s1896_s10 = smov 8  }
  0x2a   : > { %1709 = dma.hbm_to_vmem [thread:$0]  (!%p1993_p12), %s2227_s2, 256, %s201_s11, [#allocation3], %s1895_s29, %s1895_s29, %s1896_s10  }
  0x2b   : > { %s1793_s18 = scalar_lea.hbm %s2229_s4, 2048 }
  0x2c   : > { %p1794_p13 = scmp.ne.s32.totalorder %s2229_s4, %s1793_s18  ;;  %p1800_p9 = scmp.lt.u32.totalorder %s1793_s18, %s2229_s4 }
  0x2e   : > { %p1796_p5 = pnand %p1794_p13, %p1767_p0 }
  0x30   : > { %p1797_p6 = pneg %p1796_p5 }
  0x32   : > { %p1802_p10 = pnand %p1800_p9, %p1797_p6 }
  0x34   : > { %1805 = shalt.err (!%p1802_p10)
}
  0x35   : > { %s1806_s11 = scalar_lea.vmem %s1997_s14, 2048  ;;  %p1814_p4 = scmp.lt.s32.totalorder %s1997_s14, %s1997_s14 }
  0x36   : > { %p1807_p1 = scmp.ne.s32.totalorder %s1997_s14, %s1806_s11  ;;  %p1815_p7 = scmp.lt.s32.totalorder %s1806_s11, %s1806_s11 }
  0x38   : > { %p1809_p2 = pnand %p1807_p1, %p1767_p0  ;;  %p1816_p8 = por %p1815_p7, %p1814_p4 }
  0x3a   : > { %p1810_p3 = pneg %p1809_p2 }
  0x3c   : > { %p1817_p11 = pnand %p1816_p8, %p1810_p3 }
  0x3e   : > { %1820 = shalt.err (!%p1817_p11)
}
  0x3f   : > { %1712 = dma.hbm_to_vmem [thread:$0]  (!%p1993_p12), %s2229_s4, 2048, %s1997_s14, [#allocation6], %s1895_s29, %s1895_s29, %s1896_s10  }
  0x40   : > { %p2239_p13 = scmp.ne.s32.totalorder %s2237_s9, 0 }
  0x41   : > { %p2240_p5 = scmp.eq.s32.totalorder (!%p2239_p13), %s1957_s25, 0 }
  0x42   : > { %251 = sbr.rel (%p2239_p13) target bundleno = 2408 (0x968), region = 44 }
  0x49   : > { %1866 = dma.done.wait (%p2240_p5), [#allocation3], 256   ;;  %p2241_p0 = pmov %p2240_p5 }
  0x4b   : > { %1868 = vsyncadd (%p2241_p0), [#allocation3], 4294967040  ;;  %p2242_p6 = pmov %p2241_p0 }
  0x4c   : > { %p2243_p9 = pmov %p2241_p0 }
  0x4d   : > { %1870 = dma.done.wait (%p2242_p6), [#allocation6], 2048  }
  0x4e   : > { %1872 = vsyncadd (%p2243_p9), [#allocation6], 4294965248  ;;  %p290_p10 = scmp.lt.s32.totalorder %s1957_s25, 3  ;;  %vm333_vm0 = vcmask 261120   ;;  %v431_v7 = vld [vmem:[#allocation2] sm:$0xff]  ;;  %v432_v8 = vld [vmem:[#allocation2 + $0x8] sm:$0xff]  ;;  %v433_v23 = vlaneseq }
  0x4f   : > { %v1636_v9 = vpack.c.bf16 %v432_v8, %v431_v7  ;;  %v308_v13 = vld [vmem:[%s2228_s3] sm:$0xff]  ;;  %v309_v14 = vld [vmem:[%s2228_s3 + $0x8] sm:$0xff]  ;;  %vm437_vm1 = vcmask 130048   ;;  %v310_v20 = vld [vmem:[%s2228_s3 + $0x10] sm:$0xff]  ;;  %vm1898_vm2 = vmmov 0   ;;  %vm960_vm3 = vcmask 1041409  }
  0x50   : > { %s291_s12 = scalar_select %p290_p10, %s1957_s25, 3  ;;  %v1640_v15 = vpack.c.bf16 %v309_v14, %v308_v13  ;;  %v311_v21 = vld [vmem:[%s2228_s3 + $0x18] sm:$0xff]  ;;  %v2094_v24 = vshrl.u32 %v433_v23, 7  ;;  %v2100_v26 = vld [vmem:[%s2230_s5] sm:$0x3f]  ;;  %v313_v41 = vld [vmem:[%s2228_s3 + $0x28] sm:$0xff] }
  0x51   : > { %1637 = vmatprep.subr.bf16.mxu1 %v1636_v9  ;;  %v1644_v22 = vpack.c.bf16 %v311_v21, %v310_v20  ;;  %v312_v40 = vld [vmem:[%s2228_s3 + $0x20] sm:$0xff]  ;;  %v314_v49 = vld [vmem:[%s2228_s3 + $0x30] sm:$0xff]  ;;  %v315_v50 = vld [vmem:[%s2228_s3 + $0x38] sm:$0xff]  ;;  %v1897_v14 = vmov 0.0|0.0   ;;  %v1899_v21 = vmov 0.0   ;;  %vm1270_vm4 = vcmask 254976  }
  0x52   : > { %s1436_s14 = sshll.u32 %s291_s12, 5  ;;  %1639 = vmatpush3.bf16.msra.mxu1 %v1636_v9  ;;  %v435_v25 = vsub.s32 0, %v2094_v24  ;;  %v1656_v42 = vpack.c.bf16 %v313_v41, %v312_v40  ;;  %v1660_v51 = vpack.c.bf16 %v315_v50, %v314_v49  ;;  %v638_v52 = vsub.s32 1, %v2094_v24  ;;  %v320_v8 = vld [vmem:[#allocation5 + $0x20] sm:$0xff]  ;;  %v321_v9 = vld [vmem:[#allocation5 + $0x28] sm:$0xff]  ;;  %s287_s28 = sand.u32 1, %s1883_s22  }
  0x53   : > { %s294_s10 = scalar_lea.vmem %s2225_s0, %s1436_s14  ;;  %s299_s18 = scalar_lea.vmem %s2226_s1, %s1436_s14  ;;  %1641 = vmatprep.subr.bf16.mxu1 %v1640_v15  ;;  %v1673_v13 = vpack.c.bf16 %v321_v9, %v320_v8 }
  0x54   : > { %v300_v0 = vld [vmem:[%s294_s10] sm:$0xff]  ;;  %v301_v1 = vld [vmem:[%s294_s10 + $0x8] sm:$0xff]  ;;  %v302_v2 = vld [vmem:[%s294_s10 + $0x10] sm:$0xff]  ;;  %v436_v27 = vrot.slane %v2100_v26, %v435_v25  ;;  %v639_v53 = vrot.slane %v2100_v26, %v638_v52  ;;  %s1399_s11 = sshll.u32 %s287_s28, 1  ;;  %s1433_s13 = sshll.u32 %s1957_s25, 5 }
  0x55   : > { %v1628_v3 = vpack.c.bf16 %v301_v1, %v300_v0  ;;  %v303_v4 = vld [vmem:[%s294_s10 + $0x18] sm:$0xff]  ;;  %v2064_v5 = vld [vmem:[%s299_s18] sm:$0xff]  ;;  %v2068_v10 = vld [vmem:[%s299_s18 + $0x8] sm:$0xff]  ;;  %s289_s15 = scalar_lea.vmem [#allocation7], %s1399_s11  ;;  %s2182_s9 = scalar_lea.hbm %s2231_s6, %s1433_s13 }
  0x56   : > { %v1632_v6 = vpack.c.bf16 %v303_v4, %v302_v2  ;;  %1512 = vmatprep.mubr.msk.f32.mxu0 %vm333_vm0, %v2064_v5  ;;  %v2070_v11 = vld [vmem:[%s299_s18 + $0x10] sm:$0xff]  ;;  %v2076_v12 = vld [vmem:[%s299_s18 + $0x18] sm:$0xff]  ;;  %s1298_s12 = sshll.u32 %s289_s15, 4  ;;  %s1285_s10 = scalar_lea.sflag [#allocation4], %s287_s28  ;;  %s2184_s12 = int_to_ptr.vmem [resolvable:$true] %s1298_s12 }
  0x57   : > { %1629 = vmatprep.subr.bf16.mxu0 %v1628_v3  ;;  %s1821_s16 = scalar_lea.vmem %s2184_s12, 32  ;;  %p2244_p1 = scmp.ne.s32.totalorder %s2235_s7, 0 }
  0x58   : > { %1631 = vmatpush3.bf16.msra.mxu0 %v1628_v3  ;;  %p1822_p12 = scmp.ne.s32.totalorder %s2184_s12, %s1821_s16  ;;  %s1900_s25 = smov [#allocation7]  }
  0x59   : > { %1633 = vmatprep.subr.bf16.mxu0 %v1632_v6  ;;  %s1825_s17 = sshll.u32 %s1900_s25, 4  ;;  %s1826_s17 = int_to_ptr.vmem [resolvable:$false] %s1825_s17 }
  0x5a   : > { %p1823_p2 = pnand %p1822_p12, %p2244_p1  ;;  %s1827_s18 = scalar_lea.vmem %s1826_s17, 64 }
  0x5b   : > { %p1828_p4 = scmp.lt.s32.totalorder %s2184_s12, %s1826_s17  ;;  %p1829_p7 = scmp.lt.s32.totalorder %s1827_s18, %s1821_s16 }
  0x5c   : > { %1635 = vmatpush3.bf16.msra.mxu0 %v1632_v6  ;;  %p1824_p3 = pneg %p1823_p2 }
  0x5d   : > { %p1830_p8 = por %p1829_p7, %p1828_p4 }
  0x5f   : > { %1513 = vmatmul.mubr.msk.f32.vlgmr.msra.gmra.mrb[0].mxu0 %vm333_vm0, %v2068_v10  ;;  %p1831_p11 = pnand %p1830_p8, %p1824_p3 }
  0x60   : > { %1515 = vmatprep.mubr.msk.f32.mxu0 %vm333_vm0, %v2070_v11 }
  0x63   : > { %1516 = vmatmul.mubr.msk.f32.gmra.mrb[2].mxu0 %vm333_vm0, %v2076_v12 }
  0x64   : > { %1550 = vmatprep.mubr.msk.f32.mxu0 %vm333_vm0, %v2064_v5 }
 0x132   : > { %v1514_v16 = vpop.f32.mrb[0].mxu0 }
 0x133   : > { %v412_v17 = vpop.f32.mrb[1].mxu0 }
 0x134   : > { %1522 = vmatprep.mubr.msk.f32.mxu1 %vm437_vm1, %v412_v17 }
 0x135   : > { %1523 = vmatmul.mubr.msk.f32.vlgmr.msra.gmra.mrb[0].mxu1 %vm437_vm1, %v1514_v16  ;;  %v317_v16 = vld [vmem:[#allocation5 + $0x8] sm:$0xff] }
 0x136   : > { %v1517_v18 = vpop.f32.mrb[2].mxu0  ;;  %1643 = vmatpush3.bf16.msra.mxu1 %v1640_v15  ;;  %v316_v15 = vld [vmem:[#allocation5] sm:$0xff] }
 0x137   : > { %v422_v19 = vpop.f32.mrb[3].mxu0  ;;  %1645 = vmatprep.subr.bf16.mxu1 %v1644_v22  ;;  %v1679_v17 = vpack.c.bf16 %v317_v16, %v316_v15 }
 0x138   : > { %1525 = vmatprep.mubr.msk.f32.mxu1 %vm437_vm1, %v422_v19  ;;  %v319_v19 = vld [vmem:[#allocation5 + $0x18] sm:$0xff] }
 0x139   : > { %1526 = vmatmul.mubr.msk.f32.gmra.mrb[2].mxu1 %vm437_vm1, %v1517_v18  ;;  %v323_v18 = vld [vmem:[#allocation5 + $0x38] sm:$0xff] }
 0x13a   : > { %1647 = vmatpush3.bf16.msra.mxu1 %v1644_v22  ;;  %v828_v22 = vsub.s32 2, %v2094_v24 }
 0x13b   : > { %1657 = vmatprep.subr.bf16.mxu1 %v1656_v42 }
 0x13c   : > { %v829_v23 = vrot.slane %v2100_v26, %v828_v22  ;;  %v328_v22 = vld [vmem:[#allocation5 + $0x60] sm:$0xff] }
 0x208   : > { %v1524_v28 = vpop.f32.mrb[0].mxu1 }
 0x209   : > { %v522_v29 = vadd.f32 %v1524_v28, %v436_v27  ;;  %v516_v30 = vpop.f32.mrb[1].mxu1 }
 0x20a   : > { %v517_v31 = vadd.f32 %v516_v30, %v436_v27 }
 0x20b   : > { %v536_v34 = vmax.f32 %v522_v29, 0.0 }
 0x20c   : > { %v535_v32 = vmax.f32 %v517_v31, 0.0  ;;  %v1527_v33 = vpop.f32.mrb[2].mxu1 }
 0x20d   : > { %v532_v35 = vadd.f32 %v1527_v33, %v436_v27  ;;  %v526_v36 = vpop.f32.mrb[3].mxu1 }
 0x20e   : > { %v527_v37 = vadd.f32 %v526_v36, %v436_v27  ;;  %1536 = vmatprep.mubr.msk.f32.mxu1 %vm333_vm0, %v535_v32 }
 0x20f   : > { %1537 = vmatmul.mubr.msk.f32.vlgmr.msra.gmra.mrb[4].mxu1 %vm333_vm0, %v536_v34  ;;  %v538_v39 = vmax.f32 %v532_v35, 0.0 }
 0x210   : > { %v537_v38 = vmax.f32 %v527_v37, 0.0  ;;  %1659 = vmatpush3.bf16.msra.mxu1 %v1656_v42 }
 0x211   : > { %1661 = vmatprep.subr.bf16.mxu1 %v1660_v51 }
 0x212   : > { %1539 = vmatprep.mubr.msk.f32.mxu1 %vm333_vm0, %v537_v38 }
 0x213   : > { %1540 = vmatmul.mubr.msk.f32.gmra.mrb[6].mxu1 %vm333_vm0, %v538_v39 }
 0x214   : > { %1663 = vmatpush3.bf16.msra.mxu1 %v1660_v51 }
 0x215   : > { %1672 = vmatprep.subr.bf16.mxu1 %v1897_v14 }
 0x2e2   : > { %v1538_v43 = vpop.f32.mrb[4].mxu1 }
 0x2e3   : > { %v617_v44 = vpop.f32.mrb[5].mxu1 }
 0x2e4   : > { %v1648_v45 = vpack.c.bf16 %v1538_v43, %v617_v44 }
 0x2e6   : > { %v1541_v46 = vpop.f32.mrb[6].mxu1  ;;  %1649 = vmatprep.subr.bf16.mxu0 %v1648_v45 }
 0x2e7   : > { %v627_v47 = vpop.f32.mrb[7].mxu1  ;;  %1651 = vmatpush3.bf16.msra.mxu0 %v1648_v45 }
 0x2e8   : > { %v1652_v48 = vpack.c.bf16 %v1541_v46, %v627_v47 }
 0x2ea   : > { %1653 = vmatprep.subr.bf16.mxu0 %v1652_v48 }
 0x2eb   : > { %1655 = vmatpush3.bf16.msra.mxu0 %v1652_v48 }
 0x2ee   : > { %1551 = vmatmul.mubr.msk.f32.vlgmr.msra.gmra.mrb[4].mxu0 %vm333_vm0, %v2068_v10 }
 0x2ef   : > { %1553 = vmatprep.mubr.msk.f32.mxu0 %vm333_vm0, %v2070_v11 }
 0x2f2   : > { %1554 = vmatmul.mubr.msk.f32.gmra.mrb[6].mxu0 %vm333_vm0, %v2076_v12 }
 0x2f3   : > { %1578 = vmatprep.mubr.msk.f32.mxu0 %vm333_vm0, %v2064_v5 }
 0x3c1   : > { %v1552_v54 = vpop.f32.mrb[4].mxu0 }
 0x3c2   : > { %v712_v55 = vadd.f32 %v1552_v54, %v639_v53  ;;  %v706_v56 = vpop.f32.mrb[5].mxu0 }
 0x3c3   : > { %v707_v57 = vadd.f32 %v706_v56, %v639_v53 }
 0x3c4   : > { %v726_v60 = vmax.f32 %v712_v55, 0.0 }
 0x3c5   : > { %v725_v58 = vmax.f32 %v707_v57, 0.0  ;;  %v1555_v59 = vpop.f32.mrb[6].mxu0 }
 0x3c6   : > { %v722_v61 = vadd.f32 %v1555_v59, %v639_v53  ;;  %v716_v62 = vpop.f32.mrb[7].mxu0 }
 0x3c7   : > { %v717_v63 = vadd.f32 %v716_v62, %v639_v53  ;;  %1564 = vmatprep.mubr.msk.f32.mxu1 %vm333_vm0, %v725_v58 }
 0x3c8   : > { %1565 = vmatmul.mubr.msk.f32.vlgmr.msra.gmra.mrb[8].mxu1 %vm333_vm0, %v726_v60  ;;  %v728_v1 = vmax.f32 %v722_v61, 0.0 }
 0x3c9   : > { %v727_v0 = vmax.f32 %v717_v63, 0.0  ;;  %1674 = vmatpush3.bf16.msra.mxu1 %v1673_v13 }
 0x3ca   : > { %1675 = vmatprep.subr.bf16.mxu1 %v1897_v14 }
 0x3cb   : > { %1567 = vmatprep.mubr.msk.f32.mxu1 %vm333_vm0, %v727_v0 }
 0x3cc   : > { %1568 = vmatmul.mubr.msk.f32.gmra.mrb[10].mxu1 %vm333_vm0, %v728_v1 }
 0x3cd   : > { %1592 = vmatprep.mubr.msk.f32.mxu1 %vm1898_vm2, %v1899_v21 }
 0x49b   : > { %v1566_v2 = vpop.f32.mrb[8].mxu1 }
 0x49c   : > { %v807_v3 = vpop.f32.mrb[9].mxu1 }
 0x49d   : > { %v1664_v4 = vpack.c.bf16 %v1566_v2, %v807_v3 }
 0x49f   : > { %v1569_v5 = vpop.f32.mrb[10].mxu1  ;;  %1665 = vmatprep.subr.bf16.mxu0 %v1664_v4 }
 0x4a0   : > { %v817_v6 = vpop.f32.mrb[11].mxu1  ;;  %1667 = vmatpush3.bf16.msra.mxu0 %v1664_v4 }
 0x4a1   : > { %v1668_v7 = vpack.c.bf16 %v1569_v5, %v817_v6 }
 0x4a3   : > { %1669 = vmatprep.subr.bf16.mxu0 %v1668_v7 }
 0x4a4   : > { %1671 = vmatpush3.bf16.msra.mxu0 %v1668_v7 }
 0x4a5   : > { %1678 = vmatprep.subr.bf16.mxu0 %v1897_v14 }
 0x4a7   : > { %1579 = vmatmul.mubr.msk.f32.vlgmr.msra.gmra.mrb[8].mxu0 %vm333_vm0, %v2068_v10  ;;  %v322_v10 = vld [vmem:[#allocation5 + $0x30] sm:$0xff] }
 0x4a8   : > { %1581 = vmatprep.mubr.msk.f32.mxu0 %vm333_vm0, %v2070_v11  ;;  %1680 = vmatpush3.bf16.msra.mxu0 %v1679_v17  ;;  %v1676_v11 = vpack.c.bf16 %v323_v18, %v322_v10  ;;  %v324_v10 = vld [vmem:[#allocation5 + $0x40] sm:$0xff]  ;;  %v325_v18 = vld [vmem:[#allocation5 + $0x48] sm:$0xff] }
 0x4a9   : > { %1681 = vmatprep.subr.bf16.mxu0 %v1897_v14 }
 0x4aa   : > { %1677 = vmatpush3.bf16.msra.mxu1 %v1676_v11  ;;  %v1685_v11 = vpack.c.bf16 %v325_v18, %v324_v10 }
 0x4ab   : > { %1582 = vmatmul.mubr.msk.f32.gmra.mrb[10].mxu0 %vm333_vm0, %v2076_v12  ;;  %v318_v12 = vld [vmem:[#allocation5 + $0x10] sm:$0xff]  ;;  %1684 = vmatprep.subr.bf16.mxu1 %v1897_v14 }
 0x4ac   : > { %v1682_v20 = vpack.c.bf16 %v319_v19, %v318_v12  ;;  %1603 = vmatprep.mubr.msk.f32.mxu0 %vm1898_vm2, %v1899_v21  ;;  %v326_v12 = vld [vmem:[#allocation5 + $0x50] sm:$0xff]  ;;  %v327_v19 = vld [vmem:[#allocation5 + $0x58] sm:$0xff] }
 0x4ae   : > { %1683 = vmatpush3.bf16.msra.mxu0 %v1682_v20  ;;  %v1688_v20 = vpack.c.bf16 %v327_v19, %v326_v12 }
 0x4af   : > { %1690 = vmatprep.subr.bf16.mxu0 %v1897_v14 }
 0x57a   : > { %v1580_v25 = vpop.f32.mrb[8].mxu0 }
 0x57b   : > { %v902_v27 = vadd.f32 %v1580_v25, %v829_v23  ;;  %v896_v28 = vpop.f32.mrb[9].mxu0 }
 0x57c   : > { %v897_v29 = vadd.f32 %v896_v28, %v829_v23 }
 0x57d   : > { %v916_v30 = vmax.f32 %v902_v27, 0.0  ;;  %v1111_v27 = vsub.s32 3, %v2094_v24 }
 0x57e   : > { %v915_v31 = vmax.f32 %v897_v29, 0.0  ;;  %v1583_v32 = vpop.f32.mrb[10].mxu0 }
 0x57f   : > { %v920_v33 = vsel %vm333_vm0, %v916_v30, 0.0  ;;  %v941_v34 = vsel %vm333_vm0, %v916_v30, -inf  ;;  %v912_v35 = vadd.f32 %v1583_v32, %v829_v23  ;;  %v906_v36 = vpop.f32.mrb[11].mxu0  ;;  %v1112_v29 = vrot.slane %v2100_v26, %v1111_v27 }
 0x580   : > { %v919_v37 = vsel %vm333_vm0, %v915_v31, 0.0  ;;  %v940_v38 = vsel %vm333_vm0, %v915_v31, -inf  ;;  %v907_v39 = vadd.f32 %v906_v36, %v829_v23  ;;  %v329_v23 = vld [vmem:[#allocation5 + $0x68] sm:$0xff]  ;;  %v331_v36 = vld [vmem:[#allocation5 + $0x78] sm:$0xff] }
 0x581   : > { %v921_v40 = vadd.f32 %v920_v33, %v919_v37  ;;  %v942_v41 = vmax.f32 %v940_v38, %v941_v34  ;;  %v918_v42 = vmax.f32 %v912_v35, 0.0  ;;  %v1691_v25 = vpack.c.bf16 %v329_v23, %v328_v22  ;;  %v330_v35 = vld [vmem:[#allocation5 + $0x70] sm:$0xff] }
 0x582   : > { %v917_v43 = vmax.f32 %v907_v39, 0.0  ;;  %v1694_v37 = vpack.c.bf16 %v331_v36, %v330_v35  ;;  %v1117_v38 = vsub.s32 4, %v2094_v24 }
 0x583   : > { %v922_v44 = vrot.slane %v921_v40, 4  ;;  %v943_v45 = vrot.slane %v942_v41, 4  ;;  %v929_v46 = vsel %vm333_vm0, %v918_v42, 0.0  ;;  %v950_v47 = vsel %vm333_vm0, %v918_v42, -inf }
 0x584   : > { %v928_v48 = vsel %vm333_vm0, %v917_v43, 0.0  ;;  %v949_v49 = vsel %vm333_vm0, %v917_v43, -inf  ;;  %v1195_v43 = vsub.s32 5, %v2094_v24 }
 0x585   : > { %v923_v50 = vadd.f32 %v922_v44, %v921_v40  ;;  %v944_v51 = vmax.f32 %v942_v41, %v943_v45  ;;  %v930_v52 = vadd.f32 %v929_v46, %v928_v48  ;;  %v951_v53 = vmax.f32 %v949_v49, %v950_v47 }
 0x586   : > { %v1196_v44 = vrot.slane %v2100_v26, %v1195_v43 }
 0x587   : > { %v924_v54 = vrot.slane %v923_v50, 2  ;;  %v945_v55 = vrot.slane %v944_v51, 2  ;;  %v931_v56 = vrot.slane %v930_v52, 4  ;;  %v952_v57 = vrot.slane %v951_v53, 4 }
 0x589   : > { %v925_v58 = vadd.f32 %v924_v54, %v923_v50  ;;  %v946_v59 = vmax.f32 %v944_v51, %v945_v55  ;;  %v932_v60 = vadd.f32 %v931_v56, %v930_v52  ;;  %v953_v61 = vmax.f32 %v951_v53, %v952_v57 }
 0x58b   : > { %v926_v62 = vrot.slane %v925_v58, 1  ;;  %v933_v63 = vrot.slane %v932_v60, 2  ;;  %v954_v0 = vrot.slane %v953_v61, 2  ;;  %v947_v1 = vrot.slane %v946_v59, 1 }
 0x58d   : > { %v934_v2 = vadd.f32 %v933_v63, %v932_v60  ;;  %v955_v3 = vmax.f32 %v953_v61, %v954_v0  ;;  %v927_v4 = vadd.f32 %v926_v62, %v925_v58  ;;  %v948_v7 = vmax.f32 %v946_v59, %v947_v1 }
 0x58f   : > { %v935_v5 = vrot.slane %v934_v2, 1  ;;  %v956_v6 = vrot.slane %v955_v3, 1  ;;  %v938_v13 = vmul.f32 0.0625, %v927_v4 }
 0x591   : > { %v936_v8 = vadd.f32 %v935_v5, %v934_v2  ;;  %v957_v9 = vmax.f32 %v955_v3, %v956_v6 }
 0x593   : > { %v939_v15 = vmul.f32 0.0625, %v936_v8  ;;  %v961_v16 = vsel %vm960_vm3, %v957_v9, %v948_v7 }
 0x594   : > { %1593 = vmatmul.mubr.msk.f32.vlgmr.msra.gmra.mrb[12].mxu1 %vm333_vm0, %v961_v16 }
 0x595   : > { %v1036_v17 = vsel %vm960_vm3, %v939_v15, %v938_v13  ;;  %1614 = vmatprep.mubr.msk.f32.mxu1 %vm1898_vm2, %v1899_v21  ;;  %1686 = vmatpush3.bf16.msra.mxu1 %v1685_v11 }
 0x596   : > { %1604 = vmatmul.mubr.msk.f32.vlgmr.msra.gmra.mrb[12].mxu0 %vm333_vm0, %v1036_v17  ;;  %1687 = vmatprep.subr.bf16.mxu1 %v1897_v14 }
 0x597   : > { %1625 = vmatprep.mubr.msk.f32.mxu0 %vm1898_vm2, %v1899_v21  ;;  %1692 = vmatpush3.bf16.msra.mxu0 %v1691_v25 }
 0x598   : > { %1693 = vmatprep.subr.bf16.mxu0 %v1897_v14  ;;  %v1118_v14 = vrot.slane %v2100_v26, %v1117_v38 }
 0x599   : > { %1689 = vmatpush3.bf16.msra.mxu1 %v1688_v20 }
 0x59b   : > { %1695 = vmatpush3.bf16.msra.mxu0 %v1694_v37 }
 0x667   : > { %v1030_v28 = vpop.f32.mrb[12].mxu1 }
 0x668   : > { %v1594_v21 = vpop.f32.mrb[13].mxu1 }
 0x669   : > { %v1105_v30 = vpop.f32.mrb[12].mxu0 }
 0x66a   : > { %v1106_v31 = vadd.f32 %v1105_v30, %v1030_v28  ;;  %v1605_v32 = vpop.f32.mrb[13].mxu0 }
 0x66c   : > { %v1113_v33 = vadd.f32 %v1112_v29, %v1106_v31 }
 0x66e   : > { %v1114_v34 = vmax.f32 %v1113_v33, 0.0 }
 0x670   : > { %1615 = vmatmul.mubr.msk.f32.vlgmr.msra.gmra.mrb[14].mxu1 %vm333_vm0, %v1114_v34 }
 0x743   : > { %v1188_v39 = vpop.f32.mrb[14].mxu1 }
 0x744   : > { %v1189_v40 = vadd.f32 %v1188_v39, %v1118_v14  ;;  %v1616_v41 = vpop.f32.mrb[15].mxu1 }
 0x746   : > { %v1192_v42 = vmax.f32 %v1189_v40, 0.0 }
 0x748   : > { %1626 = vmatmul.mubr.msk.f32.vlgmr.msra.gmra.mrb[14].mxu0 %vm333_vm0, %v1192_v42 }
 0x81b   : > { %v1266_v45 = vpop.f32.mrb[14].mxu0 }
 0x81c   : > { %v1267_v46 = vadd.f32 %v1266_v45, %v1196_v44  ;;  %v1627_v47 = vpop.f32.mrb[15].mxu0 }
 0x81e   : > { %v1271_v48 = vsel %vm1270_vm4, %v1267_v46, -inf }
 0x81f   : > { %1272 = vmax.xlane.f32.xlu0 %v1271_v48 }
 0x8ac   : > { %v1273_v49 = vpop.xlane.xlu0 %1272 }
 0x8ad   : > { %v1274_v50 = vsub.f32 %v1267_v46, %v1273_v49 }
 0x8af   : > { %v1275_v51 = vmul.f32 1.442695, %v1274_v50 }
 0x8b1   : > { %1761 = vpow2.f32 %v1275_v51 }
 0x8bb   : > { %v1762_v52 = vpop.eup %1761 }
 0x8bc   : > { %v1277_v53 = vsel %vm1270_vm4, %v1762_v52, 0.0 }
 0x8bd   : > { %1278 = vadd.xlane.f32.xlu0 %v1277_v53 }
 0x94a   : > { %v1279_v24 = vpop.xlane.xlu0 %1278 }
 0x94b   : > { %1763 = vlog2.f32 %v1279_v24 }
 0x955   : > { %v1764_v26 = vpop.eup %1763 }
 0x956   : > { %v1281_v54 = vmul.f32 0.6931472, %v1764_v26 }
 0x958   : > { %v1282_v55 = vsub.f32 %v1274_v50, %v1281_v54 }
 0x95a   : > { %1283 = vst.msk [vmem:[%s289_s15] sm:$0x3] %vm1270_vm4, %v1282_v55 }
 0x95b   : > { %1834 = shalt.err (!%p1831_p11)
}
 0x95c   : > { %s1835_s19 = scalar_lea.hbm %s2182_s9, 32  ;;  %s1839_s28 = scalar_lea.hbm %s2231_s6, 128 }
 0x95d   : > { %p1836_p13 = scmp.ne.s32.totalorder %s2182_s9, %s1835_s19  ;;  %p1840_p6 = scmp.lt.u32.totalorder %s2182_s9, %s2231_s6 }
 0x95e   : > { %p1841_p9 = scmp.lt.u32.totalorder %s1839_s28, %s1835_s19  ;;  %p1843_p12 = scmp.lt.u32.totalorder %s1835_s19, %s2182_s9 }
 0x95f   : > { %p1837_p5 = pnand %p1836_p13, %p2244_p1 }
 0x960   : > { %p1842_p10 = por %p1841_p9, %p1840_p6 }
 0x961   : > { %p1838_p0 = pneg %p1837_p5 }
 0x962   : > { %p1844_p2 = por %p1843_p12, %p1842_p10 }
 0x964   : > { %p1845_p3 = pnand %p1844_p2, %p1838_p0 }
 0x966   : > { %1848 = shalt.err (!%p1845_p3)
}
 0x967   : > { %1704 = dma.vmem_to_hbm [thread:$0]  (%p2244_p1), %s2184_s12, 32, %s2182_s9, %s1285_s10  }
 0x968 PF: > { %p1721_p4 = scmp.ge.s32.totalorder %s1891_s24, 2  ;;  %s1310_s15 = sand.u32 1, %s1879_s21  }
 0x969   : > { %p2245_p7 = scmp.ne.s32.totalorder %s2236_s8, 0  ;;  %s1311_s14 = scalar_lea.sflag [#allocation4], %s1310_s15 }
 0x96b   : > { %p1714_p8 = pnand %p1721_p4, %p2245_p7 }
 0x96d   : > { %1874 = dma.done.wait (!%p1714_p8), %s1311_s14, 32  }
 0x96e   : > { %1876 = vsyncadd (!%p1714_p8), %s1311_s14, 4294967264  ;;  %p18_p11 = scmp.ge.s32.totalorder %s1961_s27, 6   ;;  %s2246_s21 = smov %s1883_s22 }
 0x96f   : > { %s2247_s22 = smov %s1887_s23  ;;  %s2248_s23 = smov %s1972_s30 }
 0x970   : > { %s2249_s24 = smov %s1961_s27  ;;  %20 = sbr.rel (!%p18_p11) target bundleno = 5 (0x5), region = 91 }
 0x977   :  { %1316 = vsyncpa [#allocation3], 1 }
 0x978   :  { %1318 = vsyncpa [#allocation3 + $0x1], 1 }
 0x979   :  { %1319 = vsyncpa [#allocation6], 1 }
 0x97a   :  { %1320 = vsyncpa [#allocation4], 1 }
 0x97b   :  { %1322 = vsyncpa [#allocation4 + $0x1], 1 }

</bundles_post_ra>
